<compile_context>
chip_gen: v6e
topology: v6e:2x2x1
jax: 0.10.0
libtpu: 0.0.40
codegen_flags: <defaults>
</compile_context>

<pallas_src>
import functools

import jax
import jax.numpy as jnp
from jax.experimental import pallas as pl
from jax.experimental.pallas import tpu as pltpu

SLAB_WIDTH = 1024                 # lane-dense slab width (multiple of 128)
MIN_GRAIN = 8 * 128               # one (8,128) f32 tile = 1024 elements
TARGET_BLOCK_ELEMS = 256 * 1024   # 1 MiB f32 per buffer per grid step


def _round_up(x, m):
    return (x + m - 1) // m * m


def _sampler_kernel(mu_ref, cov_ref, eps_ref, out_ref):
    # Pure elementwise: out = mu + exp(0.5 * cov) * eps  (compute in f32).
    mu = mu_ref[...].astype(jnp.float32)
    cov = cov_ref[...].astype(jnp.float32)
    eps = eps_ref[...].astype(jnp.float32)
    out_ref[...] = (mu + jnp.exp(0.5 * cov) * eps).astype(out_ref.dtype)


@jax.jit
def sampler_forward(mu, cov, key):
    """mu, cov: same-shape float arrays (any rank). Returns mu + exp(0.5*cov)*N(0,1)."""
    assert mu.shape == cov.shape, "mu and cov must have identical shapes"
    orig_shape = mu.shape
    dtype = mu.dtype
    n = mu.size

    # Choose a block: whole (padded) array if it is small, else 1 MiB tiles.
    n_pad = _round_up(max(n, 1), MIN_GRAIN)
    if n_pad > TARGET_BLOCK_ELEMS:
        block_elems = TARGET_BLOCK_ELEMS
        n_pad = _round_up(n_pad, block_elems)
    else:
        block_elems = n_pad

    w = SLAB_WIDTH                    # n_pad and block_elems are multiples of 1024
    rows = n_pad // w
    tm = block_elems // w             # 256 for large inputs, == rows for small ones
    grid = (rows // tm,)

    mu_flat = mu.reshape(-1)
    cov_flat = cov.reshape(-1)
    if n_pad != n:                    # only pad when shapes are not block-aligned
        mu_flat = jnp.pad(mu_flat, (0, n_pad - n))
        cov_flat = jnp.pad(cov_flat, (0, n_pad - n))
    mu2 = mu_flat.reshape(rows, w)
    cov2 = cov_flat.reshape(rows, w)

    # Standard-normal noise, generated at the padded slab shape (fused by XLA
    # inside the same jit; no separate host-side pad needed for it).
    eps2 = jax.random.normal(key, (rows, w), dtype=jnp.float32)

    out2 = pl.pallas_call(
        _sampler_kernel,
        out_shape=jax.ShapeDtypeStruct((rows, w), dtype),
        grid_spec=pltpu.PrefetchScalarGridSpec(
            num_scalar_prefetch=0,
            grid=grid,
            in_specs=[
                pl.BlockSpec((tm, w), lambda i: (i, 0)),
                pl.BlockSpec((tm, w), lambda i: (i, 0)),
                pl.BlockSpec((tm, w), lambda i: (i, 0)),
            ],
            out_specs=pl.BlockSpec((tm, w), lambda i: (i, 0)),
        ),
        compiler_params=pltpu.CompilerParams(
            dimension_semantics=("parallel",),   # tiles are independent
        ),
    )(mu2, cov2, eps2)

    out_flat = out2.reshape(-1)
    if n_pad != n:
        out_flat = out_flat[:n]
    return out_flat.reshape(orig_shape)


if __name__ == "__main__":
    # NCHW-style inputs (Sampler forward takes x = (mu, cov)).
    key = jax.random.PRNGKey(0)
    k_mu, k_cov, k_eps = jax.random.split(key, 3)
    B, C, H, W = 2, 4, 16, 16
    mu = jax.random.normal(k_mu, (B, C, H, W), dtype=jnp.float32)
    cov = jax.random.normal(k_cov, (B, C, H, W), dtype=jnp.float32)  # log-variance

    out = sampler_forward(mu, cov, k_eps)
    out = jax.block_until_ready(out)

    assert out.shape == mu.shape, f"shape mismatch: {out.shape} vs {mu.shape}"
    assert out.dtype == mu.dtype
    assert bool(jnp.all(jnp.isfinite(out)))
    # Residual noise (out - mu) / exp(0.5*cov) should look standard normal.
    z = (out - mu) / jnp.exp(0.5 * cov)
    assert abs(float(jnp.mean(z))) < 0.2
    assert 0.7 < float(jnp.std(z)) < 1.3

    # Also exercise the padded-tail path with a BaseVAE-like (B, 10) latent.
    k2_mu, k2_cov, k2_eps = jax.random.split(jax.random.PRNGKey(1), 3)
    mu_l = jax.random.normal(k2_mu, (2, 10), dtype=jnp.float32)
    cov_l = jax.random.normal(k2_cov, (2, 10), dtype=jnp.float32)
    out_l = jax.block_until_ready(sampler_forward(mu_l, cov_l, k2_eps))
    assert out_l.shape == mu_l.shape
    assert out_l.dtype == mu_l.dtype
    assert bool(jnp.all(jnp.isfinite(out_l)))

    print("KERNEL_OK")
</pallas_src>

<mosaic_0001>
module attributes {stable_mosaic.version = 11 : i64} {
  func.func @_sampler_kernel(%arg0: i32, %arg1: memref<2x1024xf32, #tpu.memory_space<vmem>>, %arg2: memref<2x1024xf32, #tpu.memory_space<vmem>>, %arg3: memref<2x1024xf32, #tpu.memory_space<vmem>>, %arg4: memref<2x1024xf32, #tpu.memory_space<vmem>>) attributes {dimension_semantics = [#tpu.dimension_semantics<parallel>], iteration_bounds = array<i64: 1>, scalar_prefetch = 0 : i64, scratch_operands = 0 : i64, tpu.core_type = #tpu.core_type<tc>, window_params = [{transform_indices = @transform_0, window_bounds = array<i64: 2, 1024>}, {transform_indices = @transform_1, window_bounds = array<i64: 2, 1024>}, {transform_indices = @transform_2, window_bounds = array<i64: 2, 1024>}, {transform_indices = @transform_3, window_bounds = array<i64: 2, 1024>}]} {
    %c0 = arith.constant 0 : index
    %c0_0 = arith.constant 0 : index
    %0 = vector.load %arg1[%c0, %c0_0] : memref<2x1024xf32, #tpu.memory_space<vmem>>, vector<2x1024xf32>
    %c0_1 = arith.constant 0 : index
    %c0_2 = arith.constant 0 : index
    %1 = vector.load %arg2[%c0_1, %c0_2] : memref<2x1024xf32, #tpu.memory_space<vmem>>, vector<2x1024xf32>
    %c0_3 = arith.constant 0 : index
    %c0_4 = arith.constant 0 : index
    %2 = vector.load %arg3[%c0_3, %c0_4] : memref<2x1024xf32, #tpu.memory_space<vmem>>, vector<2x1024xf32>
    %cst = arith.constant 5.000000e-01 : f32
    %3 = vector.broadcast %cst : f32 to vector<2x1024xf32>
    %4 = arith.mulf %3, %1 : vector<2x1024xf32>
    %5 = math.exp %4 : vector<2x1024xf32>
    %6 = arith.mulf %5, %2 : vector<2x1024xf32>
    %7 = arith.addf %0, %6 : vector<2x1024xf32>
    %c0_5 = arith.constant 0 : index
    %c0_6 = arith.constant 0 : index
    %8 = vector.load %arg4[%c0_5, %c0_6] : memref<2x1024xf32, #tpu.memory_space<vmem>>, vector<2x1024xf32>
    tpu.vector_store %arg4[%c0_5, %c0_6], %7 {strides = array<i32>} : memref<2x1024xf32, #tpu.memory_space<vmem>>, vector<2x1024xf32>,
    return
  }
  func.func @transform_0(%arg0: i32) -> (i32, i32) {
    %c0_i32 = arith.constant 0 : i32
    %c0_i32_0 = arith.constant 0 : i32
    return %arg0, %c0_i32 : i32, i32
  }
  func.func @transform_1(%arg0: i32) -> (i32, i32) {
    %c0_i32 = arith.constant 0 : i32
    %c0_i32_0 = arith.constant 0 : i32
    return %arg0, %c0_i32 : i32, i32
  }
  func.func @transform_2(%arg0: i32) -> (i32, i32) {
    %c0_i32 = arith.constant 0 : i32
    %c0_i32_0 = arith.constant 0 : i32
    return %arg0, %c0_i32 : i32, i32
  }
  func.func @transform_3(%arg0: i32) -> (i32, i32) {
    %c0_i32 = arith.constant 0 : i32
    %c0_i32_0 = arith.constant 0 : i32
    return %arg0, %c0_i32 : i32, i32
  }
}

</mosaic_0001>

<bundles_post_ra>
// kernel: sampler_forward.1
= control target key start
LH: loop header
LB: loop body
LE: loop exit
PB: predicated region body
PF: predicated region fallthrough
CT: control target
= control target key end

     0   :  { %s84_s1 = inlined_call_operand.vmem [shape: f32[2,1024], index: 1, kind: input, shape index: {}]   ;;  %s85_s2 = inlined_call_operand.vmem [shape: f32[2,1024], index: 2, kind: input, shape index: {}]   ;;  %s86_s0 = inlined_call_operand.vmem [shape: f32[2,1024], index: 0, kind: input, shape index: {}]   ;;  %s87_s3 = inlined_call_operand.vmem [shape: f32[2,1024], index: 3, kind: output, shape index: {}]  }
   0x1   :  { %v16_v0 = vld [vmem:[%s84_s1] sm:$0xff]  ;;  %v17_v2 = vld [vmem:[%s84_s1 + $0x8] sm:$0xff] }
   0x2   :  { %v20_v1 = vmul.f32 0.5, %v16_v0  ;;  %v21_v3 = vmul.f32 0.5, %v17_v2  ;;  %v18_v6 = vld [vmem:[%s85_s2] sm:$0xff]  ;;  %v19_v7 = vld [vmem:[%s85_s2 + $0x8] sm:$0xff] }
   0x3   :  { %v14_v9 = vld [vmem:[%s86_s0] sm:$0xff]  ;;  %v15_v12 = vld [vmem:[%s86_s0 + $0x8] sm:$0xff] }
   0x4   :  { %v22_v4 = vmul.f32 1.442695, %v20_v1  ;;  %v24_v5 = vmul.f32 1.442695, %v21_v3 }
   0x6   :  { %36 = vpow2.f32 %v22_v4 }
   0x7   :  { %38 = vpow2.f32 %v24_v5 }
  0x13   :  { %v37_v8 = vpop.eup %36 }
  0x14   :  { %v39_v10 = vpop.eup %38  ;;  %v26_v11 = vmul.f32 %v37_v8, %v18_v6 }
  0x15   :  { %v27_v13 = vmul.f32 %v39_v10, %v19_v7 }
  0x16   :  { %v28_v14 = vadd.f32 %v26_v11, %v14_v9 }
  0x17   :  { %v29_v15 = vadd.f32 %v27_v13, %v15_v12 }
  0x18   :  { %30 = vst [vmem:[%s87_s3] sm:$0xff] %v28_v14 }
  0x19   :  { %31 = vst [vmem:[%s87_s3 + $0x8] sm:$0xff] %v29_v15 }

</bundles_post_ra>
